<compile_context>
chip_gen: v7x
topology: tpu7x:2x2x1
jax: 0.10.0
libtpu: 0.0.40
codegen_flags: <defaults>
</compile_context>

<pallas_src>
import math
import jax
import jax.numpy as jnp
from jax.experimental import pallas as pl
from jax.experimental.pallas import tpu as pltpu


def _adapt_linear_kernel(inv_ref, xq_ref, wq_ref, b_ref, o_ref, acc_ref):
    # inv_ref: SMEM f32[1]           = [1 / (sf_a * sf_w)]
    # xq_ref:  VMEM bf16 (tm, tk)    quantized activations (integer values)
    # wq_ref:  VMEM bf16 (tk, tn)    quantized, pre-transposed weights
    # b_ref:   VMEM f32  (1, tn)     dequantized bias (qb / sf_b)
    # o_ref:   VMEM f32  (tm, tn)
    # acc_ref: VMEM f32  (tm, tn)    K-reduction accumulator (resident across k)
    k = pl.program_id(2)

    @pl.when(k == 0)
    def _():
        acc_ref[...] = jnp.zeros_like(acc_ref)

    acc_ref[...] += jnp.dot(
        xq_ref[...], wq_ref[...], preferred_element_type=jnp.float32
    )

    @pl.when(k == pl.num_programs(2) - 1)
    def _():
        o_ref[...] = (acc_ref[...] * inv_ref[0] + b_ref[...]).astype(o_ref.dtype)


def _round_up(v, m):
    return (v + m - 1) // m * m


def adapt_linear_forward(x, weight, bias=None, *, max_val=127, use_bias=True):
    """x: (B, size_in) f32; weight: (size_out, size_in) f32; bias: (size_out,) f32."""
    B, size_in = x.shape
    size_out = weight.shape[0]
    max_val_f = jnp.float32(max_val)

    def _safe_scale(t):
        m = jnp.max(jnp.abs(t))
        m = jnp.where(m == 0.0, 1.0, m)
        return max_val_f / m

    def _quantize(t, sf):
        return jnp.clip(jnp.round(sf * t), -max_val_f, max_val_f)

    # Static weight: quantize once outside the kernel, store bf16 (exact ints),
    # pre-transposed to (size_in, size_out) so the matmul output is lane-dense on N.
    sf_w = _safe_scale(weight)
    wq = _quantize(weight, sf_w).astype(jnp.bfloat16).T

    # Activations: one fused quantize pass, bf16 hand-off to the kernel.
    sf_a = _safe_scale(x)
    xq = _quantize(x, sf_a).astype(jnp.bfloat16)

    # Bias: quantize + dequantize entirely in the wrapper (static parameter).
    if use_bias:
        sf_b = _safe_scale(bias)
        b_deq = (_quantize(bias, sf_b) / sf_b).astype(jnp.float32)
    else:
        b_deq = jnp.zeros((size_out,), jnp.float32)

    inv_scale = jnp.reshape(1.0 / (sf_a * sf_w), (1,)).astype(jnp.float32)

    # Tile sizes (bf16-friendly; comfortably inside VMEM on v5e/v6e/v7x with
    # double-buffering: <= ~1.3 MiB total at 128x256x512).
    tm = min(128, _round_up(B, 16))
    tn = min(256, _round_up(size_out, 128))
    tk = min(512, _round_up(size_in, 128))

    M_pad = _round_up(B, tm)
    N_pad = _round_up(size_out, tn)
    K_pad = _round_up(size_in, tk)

    xq_p = xq if (M_pad == B and K_pad == size_in) else jnp.pad(
        xq, ((0, M_pad - B), (0, K_pad - size_in)))
    wq_p = wq if (K_pad == size_in and N_pad == size_out) else jnp.pad(
        wq, ((0, K_pad - size_in), (0, N_pad - size_out)))
    b_row = b_deq.reshape(1, size_out)
    b_p = b_row if N_pad == size_out else jnp.pad(
        b_row, ((0, 0), (0, N_pad - size_out)))

    grid = (M_pad // tm, N_pad // tn, K_pad // tk)

    out = pl.pallas_call(
        _adapt_linear_kernel,
        out_shape=jax.ShapeDtypeStruct((M_pad, N_pad), jnp.float32),
        grid_spec=pltpu.PrefetchScalarGridSpec(
            num_scalar_prefetch=0,
            grid=grid,
            in_specs=[
                # scalar dequant factor -> SMEM (whole array, no tiling)
                pl.BlockSpec(memory_space=pltpu.MemorySpace.SMEM),
                pl.BlockSpec((tm, tk), lambda i, j, k: (i, k)),   # xq
                pl.BlockSpec((tk, tn), lambda i, j, k: (k, j)),   # wq (K, N)
                pl.BlockSpec((1, tn), lambda i, j, k: (0, j)),    # dequantized bias
            ],
            out_specs=pl.BlockSpec((tm, tn), lambda i, j, k: (i, j)),
            scratch_shapes=[pltpu.VMEM((tm, tn), jnp.float32)],
        ),
        compiler_params=pltpu.CompilerParams(
            dimension_semantics=("parallel", "parallel", "arbitrary")
        ),
    )(inv_scale, xq_p, wq_p, b_p)

    return out[:B, :size_out]


def reference_forward(x, weight, bias, *, max_val=127, use_bias=True):
    def scale(t):
        m = jnp.max(jnp.abs(t))
        m = jnp.where(m == 0.0, 1.0, m)
        return max_val / m

    sf_w = scale(weight)
    qw = jnp.clip(jnp.round(sf_w * weight), -max_val, max_val)
    sf_a = scale(x)
    qx = jnp.clip(jnp.round(sf_a * x), -max_val, max_val)
    out = (qx @ qw.T) / (sf_a * sf_w)
    if use_bias:
        sf_b = scale(bias)
        qb = jnp.clip(jnp.round(sf_b * bias), -max_val, max_val)
        out = out + qb / sf_b
    return out


if __name__ == "__main__":
    # Small shapes consistent with the module: Linear(size_in=32, size_out=64), batch=8.
    # NOTE: at these toy sizes the call is overhead-dominated; the kernel is
    # structured (tiled (M,N,K) grid + resident accumulator) so it scales to
    # real layer sizes unchanged.
    size_in, size_out, batch = 32, 64, 8
    max_val = 127  # nemo=False path

    key = jax.random.PRNGKey(0)
    kx, kw, kb = jax.random.split(key, 3)

    # kaiming_uniform_(a=sqrt(5)) on (size_out, size_in) -> U(-1/sqrt(fan_in), 1/sqrt(fan_in))
    fan_in = size_in
    w_bound = 1.0 / math.sqrt(fan_in)
    weight = jax.random.uniform(
        kw, (size_out, size_in), jnp.float32, minval=-w_bound, maxval=w_bound
    )
    bias = jax.random.uniform(
        kb, (size_out,), jnp.float32, minval=-w_bound, maxval=w_bound
    )
    x = jax.random.uniform(kx, (batch, size_in), jnp.float32, minval=-1.0, maxval=1.0)

    # with bias
    out = adapt_linear_forward(x, weight, bias, max_val=max_val, use_bias=True)
    out = jax.block_until_ready(out)
    ref = reference_forward(x, weight, bias, max_val=max_val, use_bias=True)
    assert out.shape == (batch, size_out), out.shape
    assert jnp.allclose(out, ref, atol=1e-4, rtol=1e-4), float(jnp.max(jnp.abs(out - ref)))

    # without bias
    out_nb = adapt_linear_forward(x, weight, None, max_val=max_val, use_bias=False)
    out_nb = jax.block_until_ready(out_nb)
    ref_nb = reference_forward(x, weight, bias, max_val=max_val, use_bias=False)
    assert jnp.allclose(out_nb, ref_nb, atol=1e-4, rtol=1e-4), float(
        jnp.max(jnp.abs(out_nb - ref_nb))
    )

    print("KERNEL_OK")
</pallas_src>

<mosaic_0001>
module attributes {stable_mosaic.version = 11 : i64} {
  func.func @_adapt_linear_kernel(%arg0: i32, %arg1: i32, %arg2: i32, %arg3: memref<1xf32, #tpu.memory_space<smem>>, %arg4: memref<16x128xbf16, #tpu.memory_space<vmem>>, %arg5: memref<128x128xbf16, #tpu.memory_space<vmem>>, %arg6: memref<1x128xf32, #tpu.memory_space<vmem>>, %arg7: memref<16x128xf32, #tpu.memory_space<vmem>>, %arg8: memref<16x128xf32, #tpu.memory_space<vmem>>) attributes {dimension_semantics = [#tpu.dimension_semantics<parallel>, #tpu.dimension_semantics<parallel>, #tpu.dimension_semantics<arbitrary>], iteration_bounds = array<i64: 1, 1, 1>, scalar_prefetch = 0 : i64, scratch_operands = 1 : i64, tpu.core_type = #tpu.core_type<tc>, window_params = [{transform_indices = @transform_0, window_bounds = array<i64: 1>}, {transform_indices = @transform_1, window_bounds = array<i64: 16, 128>}, {transform_indices = @transform_2, window_bounds = array<i64: 128, 128>}, {transform_indices = @transform_3, window_bounds = array<i64: 1, 128>}, {transform_indices = @transform_4, window_bounds = array<i64: 16, 128>}]} {
    %c0_i32 = arith.constant 0 : i32
    %0 = arith.cmpi eq, %arg2, %c0_i32 : i32
    %1 = arith.extui %0 : i1 to i32
    %c0_i32_0 = arith.constant 0 : i32
    %2 = arith.cmpi ne, %1, %c0_i32_0 : i32
    scf.if %2 {
      %cst_10 = arith.constant 0.000000e+00 : f32
      %12 = vector.broadcast %cst_10 : f32 to vector<16x128xf32>
      %c0_11 = arith.constant 0 : index
      %c0_12 = arith.constant 0 : index
      %13 = vector.load %arg8[%c0_11, %c0_12] : memref<16x128xf32, #tpu.memory_space<vmem>>, vector<16x128xf32>
      tpu.vector_store %arg8[%c0_11, %c0_12], %12 {strides = array<i32>} : memref<16x128xf32, #tpu.memory_space<vmem>>, vector<16x128xf32>,
    } else {
    }
    %c0 = arith.constant 0 : index
    %c0_1 = arith.constant 0 : index
    %3 = vector.load %arg8[%c0, %c0_1] : memref<16x128xf32, #tpu.memory_space<vmem>>, vector<16x128xf32>
    %c0_2 = arith.constant 0 : index
    %c0_3 = arith.constant 0 : index
    %4 = vector.load %arg4[%c0_2, %c0_3] : memref<16x128xbf16, #tpu.memory_space<vmem>>, vector<16x128xbf16>
    %c0_4 = arith.constant 0 : index
    %c0_5 = arith.constant 0 : index
    %5 = vector.load %arg5[%c0_4, %c0_5] : memref<128x128xbf16, #tpu.memory_space<vmem>>, vector<128x128xbf16>
    %cst = arith.constant dense<0.000000e+00> : vector<16x128xf32>
    %6 = tpu.matmul %4, %5, %cst {dimension_numbers = #tpu.dot_dimension_numbers<[1], [0], [0], [1], [0, 0, 1, 1], [], []>} : vector<16x128xbf16>, vector<128x128xbf16>, vector<16x128xf32> -> vector<16x128xf32>
    %7 = arith.addf %3, %6 : vector<16x128xf32>
    %c0_6 = arith.constant 0 : index
    %c0_7 = arith.constant 0 : index
    %8 = vector.load %arg8[%c0_6, %c0_7] : memref<16x128xf32, #tpu.memory_space<vmem>>, vector<16x128xf32>
    tpu.vector_store %arg8[%c0_6, %c0_7], %7 {strides = array<i32>} : memref<16x128xf32, #tpu.memory_space<vmem>>, vector<16x128xf32>,
    %c0_i32_8 = arith.constant 0 : i32
    %9 = arith.cmpi eq, %arg2, %c0_i32_8 : i32
    %10 = arith.extui %9 : i1 to i32
    %c0_i32_9 = arith.constant 0 : i32
    %11 = arith.cmpi ne, %10, %c0_i32_9 : i32
    scf.if %11 {
      %c0_10 = arith.constant 0 : index
      %c0_11 = arith.constant 0 : index
      %12 = vector.load %arg8[%c0_10, %c0_11] : memref<16x128xf32, #tpu.memory_space<vmem>>, vector<16x128xf32>
      %c0_12 = arith.constant 0 : index
      %13 = memref.load %arg3[%c0_12] : memref<1xf32, #tpu.memory_space<smem>>
      %14 = vector.broadcast %13 : f32 to vector<16x128xf32>
      %15 = arith.mulf %12, %14 : vector<16x128xf32>
      %c0_13 = arith.constant 0 : index
      %c0_14 = arith.constant 0 : index
      %16 = vector.load %arg6[%c0_13, %c0_14] : memref<1x128xf32, #tpu.memory_space<vmem>>, vector<1x128xf32>
      %17 = vector.broadcast %16 : vector<1x128xf32> to vector<16x128xf32>
      %18 = arith.addf %15, %17 : vector<16x128xf32>
      %c0_15 = arith.constant 0 : index
      %c0_16 = arith.constant 0 : index
      %19 = vector.load %arg7[%c0_15, %c0_16] : memref<16x128xf32, #tpu.memory_space<vmem>>, vector<16x128xf32>
      tpu.vector_store %arg7[%c0_15, %c0_16], %18 {strides = array<i32>} : memref<16x128xf32, #tpu.memory_space<vmem>>, vector<16x128xf32>,
    } else {
    }
    return
  }
  func.func @transform_0(%arg0: i32, %arg1: i32, %arg2: i32) -> i32 {
    %c0_i32 = arith.constant 0 : i32
    %c0_i32_0 = arith.constant 0 : i32
    return %c0_i32 : i32
  }
  func.func @transform_1(%arg0: i32, %arg1: i32, %arg2: i32) -> (i32, i32) {
    %c0_i32 = arith.constant 0 : i32
    return %arg0, %arg2 : i32, i32
  }
  func.func @transform_2(%arg0: i32, %arg1: i32, %arg2: i32) -> (i32, i32) {
    %c0_i32 = arith.constant 0 : i32
    return %arg2, %arg1 : i32, i32
  }
  func.func @transform_3(%arg0: i32, %arg1: i32, %arg2: i32) -> (i32, i32) {
    %c0_i32 = arith.constant 0 : i32
    %c0_i32_0 = arith.constant 0 : i32
    return %c0_i32, %arg1 : i32, i32
  }
  func.func @transform_4(%arg0: i32, %arg1: i32, %arg2: i32) -> (i32, i32) {
    %c0_i32 = arith.constant 0 : i32
    return %arg0, %arg1 : i32, i32
  }
}

</mosaic_0001>

<bundles_post_ra>
// kernel: tpu_custom_call.1
= control target key start
LH: loop header
LB: loop body
LE: loop exit
PB: predicated region body
PF: predicated region fallthrough
CT: control target
= control target key end

     0   :  { %10 = vsyncpa [#allocation5], 0  ;;  %s416_s0 = inlined_call_operand.<no memory space> [shape: f32[1], index: 0, kind: input, shape index: {}]   ;;  %s417_s1 = inlined_call_operand.hbm [shape: bf16[16,128], index: 1, kind: input, shape index: {}]   ;;  %s418_s2 = inlined_call_operand.hbm [shape: bf16[128,128], index: 2, kind: input, shape index: {}]   ;;  %s419_s3 = inlined_call_operand.vmem [shape: f32[1,128], index: 3, kind: input, shape index: {}]   ;;  %s420_s4 = inlined_call_operand.hbm [shape: f32[16,128], index: 4, kind: output, shape index: {}]  }
   0x1   :  { %11 = vsyncpa [#allocation8], 0 }
   0x2   :  { %12 = vsyncpa [#allocation6], 0  ;;  %s340_s15 = smov [#allocation4]   ;;  %s268_s19 = scalar_lea.hbm %s417_s1, 128 }
   0x3   :  { %s20_s16 = sshll.u32 %s340_s15, 4  ;;  %p269_p0 = scmp.ne.s32.totalorder %s417_s1, %s268_s19  ;;  %s21_s16 = int_to_ptr.vmem [resolvable:$true] %s20_s16 }
   0x4   :  { %p272_p1 = scmp.lt.u32.totalorder %s268_s19, %s417_s1 }
   0x6   :  { %p274_p2 = pnand %p272_p1, %p269_p0 }
   0x8   :  { %277 = shalt.err (!%p274_p2)
}
   0x9   :  { %s278_s24 = scalar_lea.vmem %s21_s16, 128  ;;  %p283_p4 = scmp.lt.s32.totalorder %s21_s16, %s21_s16 }
   0xa   :  { %p279_p3 = scmp.ne.s32.totalorder %s21_s16, %s278_s24  ;;  %p284_p5 = scmp.lt.s32.totalorder %s278_s24, %s278_s24 }
   0xc   :  { %p285_p6 = por %p284_p5, %p283_p4 }
   0xe   :  { %p286_p7 = pnand %p285_p6, %p279_p3 }
  0x10   :  { %289 = shalt.err (!%p286_p7)
}
  0x11   :  { %s341_s25 = smov 64   ;;  %s342_s26 = smov 4  }
  0x12   :  { %26 = dma.hbm_to_vmem [thread:$0]  %s417_s1, 128, %s21_s16, [#allocation5], %s341_s25, %s341_s25, %s342_s26  }
  0x13   :  { %s343_s29 = smov [#allocation7]   ;;  %s290_s7 = scalar_lea.hbm %s418_s2, 1024 }
  0x14   :  { %s32_s30 = sshll.u32 %s343_s29, 4  ;;  %p291_p8 = scmp.ne.s32.totalorder %s418_s2, %s290_s7  ;;  %s33_s30 = int_to_ptr.vmem [resolvable:$true] %s32_s30 }
  0x15   :  { %p294_p9 = scmp.lt.u32.totalorder %s290_s7, %s418_s2 }
  0x17   :  { %p296_p10 = pnand %p294_p9, %p291_p8 }
  0x19   :  { %299 = shalt.err (!%p296_p10)
}
  0x1a   :  { %s300_s12 = scalar_lea.vmem %s33_s30, 1024  ;;  %p305_p12 = scmp.lt.s32.totalorder %s33_s30, %s33_s30 }
  0x1b   :  { %p301_p11 = scmp.ne.s32.totalorder %s33_s30, %s300_s12  ;;  %p306_p13 = scmp.lt.s32.totalorder %s300_s12, %s300_s12 }
  0x1d   :  { %p307_p0 = por %p306_p13, %p305_p12 }
  0x1f   :  { %p308_p1 = pnand %p307_p0, %p301_p11 }
  0x21   :  { %311 = shalt.err (!%p308_p1)
}
  0x22   :  { %38 = dma.hbm_to_vmem [thread:$0]  %s418_s2, 1024, %s33_s30, [#allocation8], %s341_s25, %s341_s25, %s342_s26  }
  0x23   :  { %334 = dma.done.wait [#allocation5], 128  }
  0x24   :  { %335 = vsyncadd [#allocation5], 4294967168 }
  0x25   :  { %336 = dma.done.wait [#allocation8], 1024  }
  0x26   :  { %337 = vsyncadd [#allocation8], 4294966272  ;;  %v344_v0 = vmov 0.0   ;;  %vm345_vm0 = vmmov 0   ;;  %v259_v1 = vld [vmem:[#allocation7] sm:$0xff]   ;;  %v260_v2 = vld [vmem:[#allocation7 + $0x8] sm:$0xff]   ;;  %v179_v10 = vstv %s416_s0 }
  0x27   :  { %230 = vmatprep.subr.bf16.mxu0 %v344_v0  ;;  %246 = vmatprep.mubr.msk.bf16.mxu0 %vm345_vm0, %v344_v0  ;;  %v261_v3 = vld [vmem:[#allocation7 + $0x10] sm:$0xff]   ;;  %v262_v4 = vld [vmem:[#allocation7 + $0x18] sm:$0xff]   ;;  %v263_v5 = vld [vmem:[#allocation7 + $0x20] sm:$0xff]   ;;  %s346_s17 = smov [#allocation9]  }
  0x28   :  { %231 = vmatpush3.bf16.msra.mxu0 %v259_v1  ;;  %v264_v6 = vld [vmem:[#allocation7 + $0x28] sm:$0xff]   ;;  %v265_v7 = vld [vmem:[#allocation7 + $0x30] sm:$0xff]   ;;  %v266_v8 = vld [vmem:[#allocation7 + $0x38] sm:$0xff]   ;;  %s198_s18 = sshll.u32 %s346_s17, 4  ;;  %s199_s18 = int_to_ptr.vmem [resolvable:$true] %s198_s18 }
  0x29   :  { %232 = vmatprep.subr.bf16.mxu0 %v344_v0  ;;  %v267_v9 = vld [vmem:[#allocation4] sm:$0xff]   ;;  %s312_s19 = scalar_lea.vmem %s199_s18, 256  ;;  %p317_p3 = scmp.lt.s32.totalorder %s199_s18, %s199_s18 }
  0x2a   :  { %v220_v12 = vld [vmem:[%s419_s3] ss:$0 sm:$0xff]  ;;  %p313_p2 = scmp.ne.s32.totalorder %s199_s18, %s312_s19  ;;  %p318_p4 = scmp.lt.s32.totalorder %s312_s19, %s312_s19 }
  0x2c   :  { %233 = vmatpush3.bf16.msra.mxu0 %v260_v2  ;;  %p319_p5 = por %p318_p4, %p317_p3 }
  0x2d   :  { %234 = vmatprep.subr.bf16.mxu0 %v344_v0 }
  0x2e   :  { %p320_p6 = pnand %p319_p5, %p313_p2 }
  0x30   :  { %235 = vmatpush3.bf16.msra.mxu0 %v261_v3 }
  0x31   :  { %236 = vmatprep.subr.bf16.mxu0 %v344_v0 }
  0x34   :  { %237 = vmatpush3.bf16.msra.mxu0 %v262_v4 }
  0x35   :  { %238 = vmatprep.subr.bf16.mxu0 %v344_v0 }
  0x38   :  { %239 = vmatpush3.bf16.msra.mxu0 %v263_v5 }
  0x39   :  { %240 = vmatprep.subr.bf16.mxu0 %v344_v0 }
  0x3c   :  { %241 = vmatpush3.bf16.msra.mxu0 %v264_v6 }
  0x3d   :  { %242 = vmatprep.subr.bf16.mxu0 %v344_v0 }
  0x40   :  { %243 = vmatpush3.bf16.msra.mxu0 %v265_v7 }
  0x41   :  { %244 = vmatprep.subr.bf16.mxu0 %v344_v0 }
  0x44   :  { %245 = vmatpush3.bf16.msra.mxu0 %v266_v8 }
  0x47   :  { %247 = vmatmul.mubr.bf16.vlgmr.msra.gmra.mrb[0].mxu0 %v267_v9 }
 0x11a   :  { %v162_v11 = vpop.f32.mrb[0].mxu0 }
 0x11b   :  { %v180_v13 = vmul.f32 %v179_v10, %v162_v11  ;;  %v248_v14 = vpop.f32.mrb[1].mxu0 }
 0x11c   :  { %v165_v15 = vpop.f32.mrb[2].mxu0 }
 0x11d   :  { %v189_v16 = vadd.f32 %v220_v12, %v180_v13  ;;  %v181_v17 = vmul.f32 %v179_v10, %v165_v15  ;;  %v249_v18 = vpop.f32.mrb[3].mxu0 }
 0x11f   :  { %191 = vst [vmem:[#allocation9] sm:$0xff] %v189_v16  ;;  %v190_v19 = vadd.f32 %v220_v12, %v181_v17 }
 0x121   :  { %192 = vst [vmem:[#allocation9 + $0x8] sm:$0xff] %v190_v19 }
 0x122   :  { %323 = shalt.err (!%p320_p6)
}
 0x123   :  { %s324_s20 = scalar_lea.hbm %s420_s4, 256 }
 0x124   :  { %p325_p7 = scmp.ne.s32.totalorder %s420_s4, %s324_s20  ;;  %p328_p8 = scmp.lt.u32.totalorder %s324_s20, %s420_s4 }
 0x126   :  { %p330_p9 = pnand %p328_p8, %p325_p7 }
 0x128   :  { %333 = shalt.err (!%p330_p9)
}
 0x129   :  { %s347_s25 = smov 128   ;;  %s348_s26 = smov 8  }
 0x12a   :  { %204 = dma.vmem_to_hbm [thread:$0]  %s199_s18, 256, %s420_s4, [#allocation6], %s347_s25, %s347_s25, %s348_s26  }
 0x12b   :  { %338 = dma.done.wait [#allocation6], 256  }
 0x12c   :  { %339 = vsyncadd [#allocation6], 4294967040 }
 0x12d   :  { %208 = vsyncpa [#allocation5], 1 }
 0x12e   :  { %209 = vsyncpa [#allocation8], 1 }
 0x12f   :  { %210 = vsyncpa [#allocation6], 1 }

</bundles_post_ra>
